<compile_context>
chip_gen: v7x
topology: tpu7x:2x2x1
jax: 0.10.0
libtpu: 0.0.40
codegen_flags: <defaults>
</compile_context>

<pallas_src>
import functools

import jax
import jax.numpy as jnp
from jax import lax
from jax.experimental import pallas as pl
from jax.experimental.pallas import tpu as pltpu


def _round_up(x, m):
    return ((x + m - 1) // m) * m


def _qkv_proj_kernel(x_ref, w_ref, qkv_ref):
    """x_ref: (1, TQ, D_pad) bf16; w_ref: (D_pad, 3*inner) bf16; qkv_ref: (1, TQ, 3*inner) bf16."""
    qkv_ref[0] = jnp.dot(x_ref[0], w_ref[...],
                         preferred_element_type=jnp.float32).astype(qkv_ref.dtype)


def _attention_kernel(q_ref, k_ref, v_ref, wout_ref, bias_ref,
                      energy_ref, y_ref, *, scale, n_valid):
    """Grid = (B, N_pad // TQ, H); head axis innermost (reduction axis for y).

    Block shapes:
      q_ref:       (1, 1, TQ,    dh)    bf16
      k_ref/v_ref: (1, 1, N_pad, dh)    bf16
      wout_ref:    (1, dh, D_pad)       bf16   (this head's slice of W_out)
      bias_ref:    (1, D_pad)           f32
      energy_ref:  (1, 1, TQ, N_pad)    f32    (pre-softmax logits)
      y_ref:       (1, TQ, D_pad)       f32    (accumulated across heads)
    """
    h = pl.program_id(2)
    q = q_ref[0, 0]                  # (TQ, dh)     bf16
    k = k_ref[0, 0]                  # (N_pad, dh)  bf16
    v = v_ref[0, 0]                  # (N_pad, dh)  bf16
    n_keys = k.shape[0]

    # energy = (q @ k^T) * scale  -- MXU, f32 accumulation.
    e = lax.dot_general(q, k, (((1,), (1,)), ((), ())),
                        preferred_element_type=jnp.float32) * scale   # (TQ, N_pad) f32
    energy_ref[0, 0] = e.astype(energy_ref.dtype)

    # Mask padded key columns so the softmax matches the unpadded computation.
    if n_valid < n_keys:
        col = lax.broadcasted_iota(jnp.int32, e.shape, 1)
        e = jnp.where(col < n_valid, e, -jnp.inf)

    m = jnp.max(e, axis=-1, keepdims=True)
    p = jnp.exp(e - m)
    p = p * pl.reciprocal(jnp.sum(p, axis=-1, keepdims=True), approx=True)

    ctx = jnp.dot(p.astype(v.dtype), v, preferred_element_type=jnp.float32)  # (TQ, dh) f32

    @pl.when(h == 0)
    def _():
        y_ref[0] = jnp.broadcast_to(
            bias_ref[...], (y_ref.shape[1], y_ref.shape[2])).astype(y_ref.dtype)

    # Per-head output projection accumulated into the resident y block.
    y_ref[0] += jnp.dot(ctx.astype(wout_ref.dtype), wout_ref[0],
                        preferred_element_type=jnp.float32)


def self_attention(x, w_qkv, w_out, b_out, *, heads, dim_head):
    """x: (B, N, D); w_qkv: (D, 3*heads*dim_head) (pre-transposed, no bias);
    w_out: (heads*dim_head, D); b_out: (D,).
    Returns (y: (B, N, D) f32, energy: (B, heads, N, N) f32)."""
    B, N, D = x.shape
    inner = heads * dim_head
    scale = dim_head ** (-0.5)

    n_pad = _round_up(N, 128)            # lane-dense energy rows/cols, 8-aligned sublanes
    d_pad = _round_up(D, 128)            # lane-dense y stores
    tq = 256 if n_pad % 256 == 0 else 128
    n_q = n_pad // tq

    x_p = jnp.pad(x, ((0, 0), (0, n_pad - N), (0, d_pad - D))).astype(jnp.bfloat16)
    w_qkv_p = jnp.pad(w_qkv, ((0, d_pad - D), (0, 0))).astype(jnp.bfloat16)

    # ---- Phase 1: QKV projection as a big GEMM (output last dim = 3*inner, lane-dense).
    qkv = pl.pallas_call(
        _qkv_proj_kernel,
        out_shape=jax.ShapeDtypeStruct((B, n_pad, 3 * inner), jnp.bfloat16),
        grid_spec=pltpu.PrefetchScalarGridSpec(
            num_scalar_prefetch=0,
            grid=(B, n_q),
            in_specs=[
                pl.BlockSpec((1, tq, d_pad), lambda b, i: (b, i, 0)),
                pl.BlockSpec((d_pad, 3 * inner), lambda b, i: (0, 0)),
            ],
            out_specs=pl.BlockSpec((1, tq, 3 * inner), lambda b, i: (b, i, 0)),
        ),
        compiler_params=pltpu.CompilerParams(
            dimension_semantics=("parallel", "parallel")),
    )(x_p, w_qkv_p)

    # Layout plumbing (plain XLA): split q/k/v and make each head a contiguous 2-D tile,
    # so the attention kernel never slices 16-wide head chunks out of a 128-lane vreg.
    q, k, v = jnp.split(qkv, 3, axis=-1)                       # each (B, n_pad, inner) bf16
    def to_heads(t):
        return t.reshape(B, n_pad, heads, dim_head).transpose(0, 2, 1, 3)
    q, k, v = map(to_heads, (q, k, v))                         # (B, H, n_pad, dh) bf16

    w_out_h = jnp.pad(w_out, ((0, 0), (0, d_pad - D)))
    w_out_h = w_out_h.reshape(heads, dim_head, d_pad).astype(jnp.bfloat16)
    b_out_p = jnp.pad(b_out, (0, d_pad - D)).reshape(1, d_pad).astype(jnp.float32)

    kernel = functools.partial(_attention_kernel, scale=scale, n_valid=N)

    # ---- Phase 2: tiled attention + per-head accumulated output projection.
    energy_p, y_p = pl.pallas_call(
        kernel,
        out_shape=(
            jax.ShapeDtypeStruct((B, heads, n_pad, n_pad), jnp.float32),
            jax.ShapeDtypeStruct((B, n_pad, d_pad), jnp.float32),
        ),
        grid_spec=pltpu.PrefetchScalarGridSpec(
            num_scalar_prefetch=0,
            grid=(B, n_q, heads),                               # head axis innermost
            in_specs=[
                pl.BlockSpec((1, 1, tq, dim_head), lambda b, i, h: (b, h, i, 0)),     # q tile
                pl.BlockSpec((1, 1, n_pad, dim_head), lambda b, i, h: (b, h, 0, 0)),  # k (full seq)
                pl.BlockSpec((1, 1, n_pad, dim_head), lambda b, i, h: (b, h, 0, 0)),  # v (full seq)
                pl.BlockSpec((1, dim_head, d_pad), lambda b, i, h: (h, 0, 0)),        # W_out[h]
                pl.BlockSpec((1, d_pad), lambda b, i, h: (0, 0)),                     # bias
            ],
            out_specs=[
                pl.BlockSpec((1, 1, tq, n_pad), lambda b, i, h: (b, h, i, 0)),        # energy tile
                pl.BlockSpec((1, tq, d_pad), lambda b, i, h: (b, i, 0)),              # y (accum over h)
            ],
        ),
        compiler_params=pltpu.CompilerParams(
            dimension_semantics=("parallel", "parallel", "arbitrary")),
    )(q, k, v, w_out_h, b_out_p)

    # TODO(synk): optional `share` additive bias on energy (forward's share=None path implemented).
    return y_p[:, :N, :D], energy_p[:, :, :N, :N]


def _reference(x, w_qkv, w_out, b_out, heads, dim_head):
    B, N, D = x.shape
    inner = heads * dim_head
    scale = dim_head ** (-0.5)
    qkv = x @ w_qkv                                   # (B, N, 3*inner)
    q, k, v = jnp.split(qkv, 3, axis=-1)
    def split_heads(t):
        return t.reshape(B, N, heads, dim_head).transpose(0, 2, 1, 3)
    q, k, v = map(split_heads, (q, k, v))
    energy = jnp.einsum('bhid,bhjd->bhij', q, k) * scale
    attn = jax.nn.softmax(energy, axis=-1)
    out = jnp.einsum('bhij,bhjd->bhid', attn, v)
    out = out.transpose(0, 2, 1, 3).reshape(B, N, inner)
    return out @ w_out + b_out, energy


if __name__ == "__main__":
    # Small shapes consistent with the module defaults.
    B, N, EMB = 2, 8, 32
    HEADS, DIM_HEAD = 8, 16
    INNER = HEADS * DIM_HEAD

    key = jax.random.PRNGKey(0)
    kx, kq, ko, kb = jax.random.split(key, 4)

    x = jax.random.normal(kx, (B, N, EMB), dtype=jnp.float32)
    # Deterministic parameter init (synthetic, not a checkpoint load).
    w_qkv = jax.random.normal(kq, (EMB, 3 * INNER), dtype=jnp.float32) * (EMB ** -0.5)
    w_out = jax.random.normal(ko, (INNER, EMB), dtype=jnp.float32) * (INNER ** -0.5)
    b_out = jax.random.normal(kb, (EMB,), dtype=jnp.float32) * 0.01

    y, energy = self_attention(x, w_qkv, w_out, b_out,
                               heads=HEADS, dim_head=DIM_HEAD)
    jax.block_until_ready((y, energy))

    # Reference in f32 on bf16-rounded operands (the kernel feeds the MXU bf16).
    rnd = lambda t: t.astype(jnp.bfloat16).astype(jnp.float32)
    y_ref, energy_ref = _reference(rnd(x), rnd(w_qkv), rnd(w_out), b_out, HEADS, DIM_HEAD)

    assert y.shape == (B, N, EMB) and energy.shape == (B, HEADS, N, N)
    assert jnp.allclose(energy, energy_ref, atol=5e-2, rtol=5e-2)
    assert jnp.allclose(y, y_ref, atol=5e-2, rtol=5e-2)

    print("KERNEL_OK")
</pallas_src>

<mosaic_0001>
module attributes {stable_mosaic.version = 11 : i64} {
  func.func @_qkv_proj_kernel(%arg0: i32, %arg1: i32, %arg2: memref<1x128x128xbf16, #tpu.memory_space<vmem>>, %arg3: memref<128x384xbf16, #tpu.memory_space<vmem>>, %arg4: memref<1x128x384xbf16, #tpu.memory_space<vmem>>) attributes {dimension_semantics = [#tpu.dimension_semantics<parallel>, #tpu.dimension_semantics<parallel>], iteration_bounds = array<i64: 2, 1>, scalar_prefetch = 0 : i64, scratch_operands = 0 : i64, tpu.core_type = #tpu.core_type<tc>, window_params = [{transform_indices = @transform_0, window_bounds = array<i64: 1, 128, 128>}, {pipeline_mode = #tpu.pipeline_mode<synchronous>, transform_indices = @transform_1, window_bounds = array<i64: 128, 384>}, {transform_indices = @transform_2, window_bounds = array<i64: 1, 128, 384>}]} {
    %c0 = arith.constant 0 : index
    %c0_0 = arith.constant 0 : index
    %c0_1 = arith.constant 0 : index
    %0 = vector.load %arg2[%c0, %c0_0, %c0_1] : memref<1x128x128xbf16, #tpu.memory_space<vmem>>, vector<1x128x128xbf16>
    %1 = vector.shape_cast %0 : vector<1x128x128xbf16> to vector<128x128xbf16>
    %c0_2 = arith.constant 0 : index
    %c0_3 = arith.constant 0 : index
    %2 = vector.load %arg3[%c0_2, %c0_3] : memref<128x384xbf16, #tpu.memory_space<vmem>>, vector<128x384xbf16>
    %cst = arith.constant dense<0.000000e+00> : vector<128x384xf32>
    %3 = tpu.matmul %1, %2, %cst {dimension_numbers = #tpu.dot_dimension_numbers<[1], [0], [0], [1], [0, 0, 1, 1], [], []>} : vector<128x128xbf16>, vector<128x384xbf16>, vector<128x384xf32> -> vector<128x384xf32>
    %4 = arith.truncf %3 : vector<128x384xf32> to vector<128x384xbf16>
    %c0_4 = arith.constant 0 : index
    %c0_5 = arith.constant 0 : index
    %c0_6 = arith.constant 0 : index
    %5 = vector.load %arg4[%c0_4, %c0_5, %c0_6] : memref<1x128x384xbf16, #tpu.memory_space<vmem>>, vector<1x128x384xbf16>
    %6 = vector.shape_cast %5 : vector<1x128x384xbf16> to vector<128x384xbf16>
    %7 = vector.shape_cast %4 : vector<128x384xbf16> to vector<1x128x384xbf16>
    tpu.vector_store %arg4[%c0_4, %c0_5, %c0_6], %7 {strides = array<i32>} : memref<1x128x384xbf16, #tpu.memory_space<vmem>>, vector<1x128x384xbf16>,
    return
  }
  func.func @transform_0(%arg0: i32, %arg1: i32) -> (i32, i32, i32) {
    %c0_i32 = arith.constant 0 : i32
    %c0_i32_0 = arith.constant 0 : i32
    return %arg0, %arg1, %c0_i32 : i32, i32, i32
  }
  func.func @transform_1(%arg0: i32, %arg1: i32) -> (i32, i32) {
    %c0_i32 = arith.constant 0 : i32
    %c0_i32_0 = arith.constant 0 : i32
    %c0_i32_1 = arith.constant 0 : i32
    return %c0_i32, %c0_i32_0 : i32, i32
  }
  func.func @transform_2(%arg0: i32, %arg1: i32) -> (i32, i32, i32) {
    %c0_i32 = arith.constant 0 : i32
    %c0_i32_0 = arith.constant 0 : i32
    return %arg0, %arg1, %c0_i32 : i32, i32, i32
  }
}

</mosaic_0001>

<bundles_post_ra>
// kernel: tpu_custom_call.1
= control target key start
LH: loop header
LB: loop body
LE: loop exit
PB: predicated region body
PF: predicated region fallthrough
CT: control target
= control target key end

     0   :  { %7 = vsyncpa [#allocation3], 0  ;;  %s1663_s0 = inlined_call_operand.hbm [shape: bf16[2,128,128], index: 0, kind: input, shape index: {}]   ;;  %s1664_s1 = inlined_call_operand.hbm [shape: bf16[128,384], index: 1, kind: input, shape index: {}]   ;;  %s1665_s2 = inlined_call_operand.hbm [shape: bf16[2,128,384], index: 2, kind: output, shape index: {}]  }
   0x1   :  { %9 = vsyncpa [#allocation3 + $0x1], 0 }
   0x2   :  { %10 = vsyncpa [#allocation6], 0 }
   0x3   :  { %11 = vsyncpa [#allocation4], 0 }
   0x4   :  { %13 = vsyncpa [#allocation4 + $0x1], 0  ;;  %s1390_s9 = smov 0   ;;  %s1392_s10 = smov 0  }
   0x5   :  { %s1394_s11 = smov 0   ;;  %s1396_s12 = smov 0  }
   0x6   :  { %s1398_s13 = smov 0   ;;  %s1400_s14 = smov 0  }
   0x7 LB: > { %s938_s15 = sadd.s32 4294967295, %s1363_s14   ;;  %s939_s16 = sadd.s32 4294967294, %s1363_s14   ;;  %s1363_s14 = sphi %s1400_s14, %s19_s14   ;;  %s1359_s13 = sphi %s1398_s13, %s1689_s13   ;;  %s1355_s12 = sphi %s1396_s12, %s1688_s12   ;;  %s1351_s11 = sphi %s1394_s11, %s1687_s11   ;;  %s1347_s10 = sphi %s1392_s10, %s1686_s10   ;;  %s1343_s9 = sphi %s1390_s9, %s1685_s9  }
   0x8   : > { %p53_p0 = scmp.ne.s32.totalorder %s1347_s10, %s1343_s9  ;;  %p1424_p1 = scmp.eq.s32.totalorder %s938_s15, 0 }
   0x9   : > { %p1428_p2 = scmp.eq.s32.totalorder %s938_s15, 1  ;;  %p106_p3 = scmp.eq.s32.totalorder %s939_s16, 1 }
   0xa   : > { %s1670_s17 = scalar_select %p1424_p1, 1, 0 }
   0xb   : > { %s1671_s18 = scalar_select %p1428_p2, 1, 0 }
   0xc   : > { %p1434_p4 = por %p1424_p1, %p53_p0  ;;  %p940_p5 = scmp.ge.s32.totalorder %s1363_s14, 1 }
   0xd   : > { %p1439_p6 = por %p106_p3, %p53_p0  ;;  %p113_p7 = scmp.lt.s32.totalorder %s1363_s14, 3 }
   0xe   : > { %s1672_s19 = scalar_select %p1434_p4, 1, 0 }
   0xf   : > { %s1673_s20 = scalar_select %p1439_p6, 1, 0 }
  0x10   : > { %p1444_p8 = pnand %p940_p5, %p113_p7  ;;  %s1365_s22 = smov [#allocation5]  }
  0x11   : > { %s125_s23 = sshll.u32 %s1365_s22, 4  ;;  %s31_s25 = sadd.s32 1, %s1359_s13  ;;  %s126_s23 = int_to_ptr.vmem [resolvable:$true] %s125_s23 }
  0x12   : > { %s1674_s21 = scalar_select %p1444_p8, 1, 0 }
  0x13   : > { %p1107_p9 = pneg %p1444_p8  ;;  %s1219_s28 = scalar_lea.hbm %s1664_s1, 3072 }
  0x14   : > { %p1220_p12 = scmp.ne.s32.totalorder %s1664_s1, %s1219_s28  ;;  %p1226_p5 = scmp.lt.u32.totalorder %s1219_s28, %s1664_s1 }
  0x15   : > { %p1453_p11 = pnand %p1107_p9, %p1424_p1 }
  0x17   : > { %p1221_p13 = pneg %p1453_p11 }
  0x19   : > { %p1222_p0 = pnand %p1221_p13, %p1220_p12 }
  0x1b   : > { %p1223_p3 = pneg %p1222_p0 }
  0x1d   : > { %p1228_p7 = pnand %p1226_p5, %p1223_p3 }
  0x1f   : > { %1231 = shalt.err (!%p1228_p7)
}
  0x20   : > { %s1232_s5 = scalar_lea.vmem %s126_s23, 3072  ;;  %p1240_p1 = scmp.lt.s32.totalorder %s126_s23, %s126_s23 }
  0x21   : > { %p1233_p9 = scmp.ne.s32.totalorder %s126_s23, %s1232_s5  ;;  %p1241_p4 = scmp.lt.s32.totalorder %s1232_s5, %s1232_s5 }
  0x23   : > { %p1235_p10 = pnand %p1233_p9, %p1221_p13  ;;  %p1242_p8 = por %p1241_p4, %p1240_p1 }
  0x25   : > { %p1236_p6 = pneg %p1235_p10 }
  0x27   : > { %p1243_p2 = pnand %p1242_p8, %p1236_p6 }
  0x29   : > { %1246 = shalt.err (!%p1243_p2)
}
  0x2a   : > { %s1366_s6 = smov 192   ;;  %s1367_s7 = smov 12  }
  0x2b   : > { %1110 = dma.hbm_to_vmem [thread:$0]  (!%p1453_p11), %s1664_s1, 3072, %s126_s23, [#allocation6], %s1366_s6, %s1366_s6, %s1367_s7  }
  0x2c   : > { %p33_p1 = scmp.ge.s32.totalorder %s31_s25, 2  ;;  %s40_s16 = sadd.s32 1, %s1351_s11 }
  0x2d   : > { %p47_p2 = scmp.ne.s32.totalorder %s1351_s11, %s1347_s10  ;;  %p48_p4 = scmp.eq.s32.totalorder %s1363_s14, 0 }
  0x2e   : > { %s1691_s25 = smov (%p33_p1, %s31_s25), 0  ;;  %p1677_p8 = scmp.ne.s32.totalorder %s1671_s18, 0 }
  0x2f   : > { %p1480_p6 = por %p48_p4, %p47_p2  ;;  %s35_s24 = ssub.s32 %s1359_s13, %s1691_s25 }
  0x30   : > { %p1486_p10 = por %p1677_p8, %p47_p2  ;;  %p1120_p12 = scmp.lt.s32.totalorder %s1363_s14, 2 }
  0x31   : > { %p38_p11 = scmp.eq.s32.totalorder %s35_s24, 0  ;;  %s139_s23 = sand.u32 1, %s1351_s11  }
  0x32   : > { %s943_s27 = sshll.u32 %s139_s23, 6  ;;  %s1016_s29 = sshll.u32 %s1359_s13, 10 }
  0x33   : > { %s1495_s28 = scalar_select %p38_p11, %s1351_s11, %s40_s16  }
  0x34   : > { %s1501_s4 = scalar_lea.hbm %s1663_s0, %s1016_s29  ;;  %s143_s18 = scalar_lea.vmem [#allocation2], %s943_s27 }
  0x35   : > { %s152_s5 = sshll.u32 %s143_s18, 4  ;;  %p1507_p13 = pnand %p1120_p12, %p1480_p6  ;;  %s1503_s5 = int_to_ptr.vmem [resolvable:$true] %s152_s5 }
  0x36   : > { %s1511_s7 = scalar_lea.sflag [#allocation3], %s139_s23  ;;  %s1247_s8 = scalar_lea.hbm %s1501_s4, 1024 }
  0x37   : > { %p1248_p0 = scmp.ne.s32.totalorder %s1501_s4, %s1247_s8  ;;  %p1249_p3 = pneg %p1507_p13 }
  0x38   : > { %s1252_s22 = scalar_lea.hbm %s1663_s0, 2048  ;;  %p1253_p9 = scmp.lt.u32.totalorder %s1501_s4, %s1663_s0 }
  0x39   : > { %p1250_p5 = pnand %p1249_p3, %p1248_p0  ;;  %p1254_p1 = scmp.lt.u32.totalorder %s1252_s22, %s1247_s8 }
  0x3a   : > { %p1256_p4 = scmp.lt.u32.totalorder %s1247_s8, %s1501_s4 }
  0x3b   : > { %p1251_p7 = pneg %p1250_p5  ;;  %p1255_p2 = por %p1254_p1, %p1253_p9 }
  0x3d   : > { %p1257_p6 = por %p1256_p4, %p1255_p2 }
  0x3f   : > { %p1258_p8 = pnand %p1257_p6, %p1251_p7 }
  0x41   : > { %1261 = shalt.err (!%p1258_p8)
}
  0x42   : > { %s1262_s23 = scalar_lea.vmem %s1503_s5, 1024  ;;  %s1368_s29 = smov [#allocation2]  }
  0x43   : > { %p1263_p12 = scmp.ne.s32.totalorder %s1503_s5, %s1262_s23  ;;  %s1267_s30 = sshll.u32 %s1368_s29, 4  ;;  %s1268_s30 = int_to_ptr.vmem [resolvable:$false] %s1267_s30 }
  0x44   : > { %s1269_s3 = scalar_lea.vmem %s1268_s30, 2048  ;;  %p1270_p5 = scmp.lt.s32.totalorder %s1503_s5, %s1268_s30 }
  0x45   : > { %p1265_p11 = pnand %p1263_p12, %p1249_p3  ;;  %p1271_p9 = scmp.lt.s32.totalorder %s1269_s3, %s1262_s23 }
  0x47   : > { %p1266_p0 = pneg %p1265_p11  ;;  %p1272_p1 = por %p1271_p9, %p1270_p5 }
  0x49   : > { %p1273_p2 = pnand %p1272_p1, %p1266_p0 }
  0x4b   : > { %1276 = shalt.err (!%p1273_p2)
}
  0x4c   : > { %s1369_s18 = smov 64   ;;  %s1370_s8 = smov 4  }
  0x4d   : > { %1114 = dma.hbm_to_vmem [thread:$0]  (!%p1507_p13), %s1501_s4, 1024, %s1503_s5, %s1511_s7, %s1369_s18, %s1369_s18, %s1370_s8  }
  0x4e   : > { %p1680_p3 = scmp.ne.s32.totalorder %s1674_s21, 0 }
  0x4f   : > { %s1542_s15 = sand.u32 (!%p1680_p3), 1, %s1347_s10   ;;  %p1681_p7 = scmp.ne.s32.totalorder (!%p1680_p3), %s1672_s19, 0 }
  0x50   : > { %164 = sbr.rel (%p1680_p3) target bundleno = 412 (0x19c), region = 28  ;;  %s947_s16 = sshll.u32 (!%p1680_p3), %s1542_s15, 6 }
  0x51   : > { %s167_s22 = scalar_lea.sflag (!%p1680_p3), [#allocation3], %s1542_s15  ;;  %s1546_s24 = scalar_lea.vmem (!%p1680_p3), [#allocation2], %s947_s16 }
  0x57   : > { %1330 = dma.done.wait (%p1681_p7), %s167_s22, 1024  }
  0x58   : > { %1332 = vsyncadd (%p1681_p7), %s167_s22, 4294966272  ;;  %p1682_p13 = scmp.ne.s32.totalorder %s1670_s17, 0 }
  0x5a   : > { %1334 = dma.done.wait (%p1682_p13), [#allocation6], 3072  }
  0x5b   : > { %1336 = vsyncadd (%p1682_p13), [#allocation6], 4294964224  ;;  %v1371_v0 = vmov 0   ;;  %v1179_v1 = vld [vmem:[#allocation5 + $0x4] ss:$12 sps:$4 sm:$0xff]   ;;  %v1207_v26 = vld [vmem:[%s1546_s24 + $0x8] sm:$0xff]  }
  0x5c   : > { %454 = vmatprep.mubr.bf16.mxu0 %v1371_v0  ;;  %v1181_v2 = vld [vmem:[#allocation5] ss:$12 sps:$4 sm:$0xff]   ;;  %422 = vmatprep.subr.bf16.mxu0 %v1179_v1  ;;  %v1182_v3 = vld [vmem:[#allocation5 + $0x1c] ss:$12 sps:$4 sm:$0xff]   ;;  %v1184_v4 = vld [vmem:[#allocation5 + $0x18] ss:$12 sps:$4 sm:$0xff]  }
  0x5d   : > { %423 = vmatpush1.bf16.msra.mxu0 %v1181_v2  ;;  %v1185_v5 = vld [vmem:[#allocation5 + $0x34] ss:$12 sps:$4 sm:$0xff]   ;;  %v1187_v6 = vld [vmem:[#allocation5 + $0x30] ss:$12 sps:$4 sm:$0xff]   ;;  %v1188_v7 = vld [vmem:[#allocation5 + $0x4c] ss:$12 sps:$4 sm:$0xff]  }
  0x5e   : > { %424 = vmatprep.subr.bf16.mxu0 %v1182_v3  ;;  %v1190_v8 = vld [vmem:[#allocation5 + $0x48] ss:$12 sps:$4 sm:$0xff]   ;;  %v1191_v9 = vld [vmem:[#allocation5 + $0x64] ss:$12 sps:$4 sm:$0xff]   ;;  %v1205_v12 = vld [vmem:[#allocation5 + $0x20] ss:$12 sps:$4 sm:$0xff]  }
  0x5f   : > { %v1203_v10 = vld [vmem:[#allocation5 + $0x8] ss:$12 sps:$4 sm:$0xff]   ;;  %v1204_v11 = vld [vmem:[%s1546_s24] sm:$0xff]   ;;  %v1208_v17 = vld [vmem:[#allocation5 + $0x50] ss:$12 sps:$4 sm:$0xff]   ;;  %s1097_s17 = smul.u32 192, %s1542_s15 }
  0x60   : > { %1065 = vmatprep.subr.bf16.mxu1 %v1203_v10  ;;  %v1193_v13 = vld [vmem:[#allocation5 + $0x60] ss:$12 sps:$4 sm:$0xff]   ;;  %1081 = vmatprep.mubr.bf16.mxu1 %v1204_v11  ;;  %v1206_v14 = vld [vmem:[#allocation5 + $0x38] ss:$12 sps:$4 sm:$0xff]   ;;  %v1194_v15 = vld [vmem:[#allocation5 + $0x7c] ss:$12 sps:$4 sm:$0xff]  }
  0x61   : > { %425 = vmatpush1.bf16.msra.mxu0 %v1184_v4  ;;  %1066 = vmatpush3.bf16.msra.mxu1 %v1203_v10  ;;  %v1196_v16 = vld [vmem:[#allocation5 + $0x78] ss:$12 sps:$4 sm:$0xff]   ;;  %v1197_v18 = vld [vmem:[#allocation5 + $0x94] ss:$12 sps:$4 sm:$0xff]   ;;  %v1199_v19 = vld [vmem:[#allocation5 + $0x90] ss:$12 sps:$4 sm:$0xff]  }
  0x62   : > { %426 = vmatprep.subr.bf16.mxu0 %v1185_v5  ;;  %1067 = vmatprep.subr.bf16.mxu1 %v1205_v12  ;;  %v1209_v20 = vld [vmem:[#allocation5 + $0x68] ss:$12 sps:$4 sm:$0xff]   ;;  %v1200_v21 = vld [vmem:[#allocation5 + $0xac] ss:$12 sps:$4 sm:$0xff]   ;;  %v1214_v25 = vld [vmem:[#allocation5 + $0xb0] ss:$12 sps:$4 sm:$0xff]  }
  0x63   : > { %v1202_v22 = vld [vmem:[#allocation5 + $0xa8] ss:$12 sps:$4 sm:$0xff]   ;;  %v1211_v23 = vld [vmem:[#allocation5 + $0x80] ss:$12 sps:$4 sm:$0xff]   ;;  %v1212_v24 = vld [vmem:[#allocation5 + $0x98] ss:$12 sps:$4 sm:$0xff]  }
  0x64   : > { %v1210_v27 = vld [vmem:[%s1546_s24 + $0x10] sm:$0xff]   ;;  %v1213_v28 = vld [vmem:[%s1546_s24 + $0x18] sm:$0xff]   ;;  %v1215_v29 = vld [vmem:[%s1546_s24 + $0x20] sm:$0xff]   ;;  %s1573_s19 = scalar_lea.vmem [#allocation7], %s1097_s17  ;;  %s1098_s21 = smul.u32 3072, %s1355_s12 }
  0x65   : > { %427 = vmatpush1.bf16.msra.mxu0 %v1187_v6  ;;  %1068 = vmatpush3.bf16.msra.mxu1 %v1205_v12  ;;  %v1216_v30 = vld [vmem:[%s1546_s24 + $0x28] sm:$0xff]   ;;  %v1217_v31 = vld [vmem:[%s1546_s24 + $0x30] sm:$0xff]   ;;  %v1218_v32 = vld [vmem:[%s1546_s24 + $0x38] sm:$0xff]   ;;  %s841_s4 = sshll.u32 %s1573_s19, 4  ;;  %s825_s12 = scalar_lea.sflag [#allocation4], %s1542_s15  ;;  %s1612_s4 = int_to_ptr.vmem [resolvable:$true] %s841_s4 }
  0x66   : > { %428 = vmatprep.subr.bf16.mxu0 %v1188_v7  ;;  %1069 = vmatprep.subr.bf16.mxu1 %v1206_v14  ;;  %s1610_s7 = scalar_lea.hbm %s1665_s2, %s1098_s21  ;;  %s1277_s27 = scalar_lea.vmem %s1612_s4, 3072 }
  0x67   : > { %p1278_p4 = scmp.ne.s32.totalorder %s1612_s4, %s1277_s27  ;;  %s1372_s23 = smov [#allocation7]  }
  0x68   : > { %s1281_s29 = sshll.u32 %s1372_s23, 4  ;;  %s1282_s29 = int_to_ptr.vmem [resolvable:$false] %s1281_s29 }
  0x69   : > { %429 = vmatpush1.bf16.msra.mxu0 %v1190_v8  ;;  %1070 = vmatpush3.bf16.msra.mxu1 %v1206_v14  ;;  %p1279_p6 = pnand %p1278_p4, %p1486_p10  ;;  %s1283_s30 = scalar_lea.vmem %s1282_s29, 6144 }
  0x6a   : > { %430 = vmatprep.subr.bf16.mxu0 %v1191_v9  ;;  %1071 = vmatprep.subr.bf16.mxu1 %v1208_v17  ;;  %p1284_p12 = scmp.lt.s32.totalorder %s1612_s4, %s1282_s29  ;;  %p1285_p11 = scmp.lt.s32.totalorder %s1283_s30, %s1277_s27 }
  0x6b   : > { %p1280_p8 = pneg %p1279_p6 }
  0x6c   : > { %p1286_p0 = por %p1285_p11, %p1284_p12 }
  0x6d   : > { %431 = vmatpush1.bf16.msra.mxu0 %v1193_v13  ;;  %1072 = vmatpush3.bf16.msra.mxu1 %v1208_v17 }
  0x6e   : > { %432 = vmatprep.subr.bf16.mxu0 %v1194_v15  ;;  %1073 = vmatprep.subr.bf16.mxu1 %v1209_v20  ;;  %p1287_p5 = pnand %p1286_p0, %p1280_p8 }
  0x71   : > { %433 = vmatpush1.bf16.msra.mxu0 %v1196_v16  ;;  %1074 = vmatpush3.bf16.msra.mxu1 %v1209_v20 }
  0x72   : > { %434 = vmatprep.subr.bf16.mxu0 %v1197_v18  ;;  %1075 = vmatprep.subr.bf16.mxu1 %v1211_v23 }
  0x75   : > { %435 = vmatpush1.bf16.msra.mxu0 %v1199_v19  ;;  %1076 = vmatpush3.bf16.msra.mxu1 %v1211_v23 }
  0x76   : > { %436 = vmatprep.subr.bf16.mxu0 %v1200_v21  ;;  %1077 = vmatprep.subr.bf16.mxu1 %v1212_v24 }
  0x79   : > { %437 = vmatpush1.bf16.msra.mxu0 %v1202_v22  ;;  %1078 = vmatpush3.bf16.msra.mxu1 %v1212_v24 }
  0x7a   : > { %1079 = vmatprep.subr.bf16.mxu1 %v1214_v25 }
  0x7c   : > { %455 = vmatmul.mubr.bf16.vlgmr.msra.gmra.mrb[0].mxu0 %v1204_v11 }
  0x7d   : > { %464 = vmatprep.mubr.bf16.mxu0 %v1371_v0  ;;  %1080 = vmatpush3.bf16.msra.mxu1 %v1214_v25 }
  0x80   : > { %1082 = vmatmul.mubr.bf16.vlgmr.msra.gmra.mrb[0].mxu1 %v1207_v26 }
  0x81   : > { %1085 = vmatprep.mubr.bf16.mxu1 %v1210_v27 }
  0x84   : > { %465 = vmatmul.mubr.bf16.gmra.mrb[4].mxu0 %v1207_v26 }
  0x85   : > { %474 = vmatprep.mubr.bf16.mxu0 %v1371_v0 }
  0x88   : > { %1086 = vmatmul.mubr.bf16.gmra.mrb[4].mxu1 %v1213_v28 }
  0x89   : > { %1089 = vmatprep.mubr.bf16.mxu1 %v1215_v29 }
  0x8c   : > { %475 = vmatmul.mubr.bf16.gmra.mrb[8].mxu0 %v1210_v27 }
  0x8d   : > { %484 = vmatprep.mubr.bf16.mxu0 %v1371_v0 }
  0x90   : > { %1090 = vmatmul.mubr.bf16.gmra.mrb[8].mxu1 %v1216_v30 }
  0x91   : > { %1093 = vmatprep.mubr.bf16.mxu1 %v1217_v31 }
  0x94   : > { %485 = vmatmul.mubr.bf16.gmra.mrb[12].mxu0 %v1213_v28 }
  0x95   : > { %494 = vmatprep.mubr.bf16.mxu0 %v1371_v0 }
  0x98   : > { %1094 = vmatmul.mubr.bf16.gmra.mrb[12].mxu1 %v1218_v32 }
  0x9c   : > { %495 = vmatmul.mubr.bf16.gmra.mrb[16].mxu0 %v1215_v29 }
  0x9d   : > { %504 = vmatprep.mubr.bf16.mxu0 %v1371_v0 }
  0xa4   : > { %505 = vmatmul.mubr.bf16.gmra.mrb[20].mxu0 %v1216_v30 }
  0xa5   : > { %514 = vmatprep.mubr.bf16.mxu0 %v1371_v0 }
  0xac   : > { %515 = vmatmul.mubr.bf16.gmra.mrb[24].mxu0 %v1217_v31 }
  0xad   : > { %524 = vmatprep.mubr.bf16.mxu0 %v1371_v0 }
  0xb4   : > { %525 = vmatmul.mubr.bf16.gmra.mrb[28].mxu0 %v1218_v32 }
 0x14f   : > { %v456_v33 = vpop.f32.mrb[0].mxu0 }
 0x150   : > { %v458_v34 = vpop.f32.mrb[1].mxu0 }
 0x151   : > { %v1017_v35 = vpack.c.bf16 %v458_v34, %v456_v33  ;;  %v460_v36 = vpop.f32.mrb[2].mxu0 }
 0x152   : > { %v462_v37 = vpop.f32.mrb[3].mxu0 }
 0x153   : > { %792 = vst [vmem:[%s1573_s19] sm:$0xff] %v1017_v35  ;;  %v1019_v38 = vpack.c.bf16 %v462_v37, %v460_v36  ;;  %v1083_v44 = vpop.f32.mrb[0].mxu1 }
 0x154   : > { %v1022_v46 = vpack.c.bf16 %v1083_v44, %v1083_v44  ;;  %v569_v47 = vpop.f32.mrb[1].mxu1 }
 0x155   : > { %794 = vst [vmem:[%s1573_s19 + $0xc] sm:$0xff] %v1019_v38  ;;  %v1018_v48 = vpack.c.bf16 %v569_v47, %v569_v47  ;;  %v1084_v49 = vpop.f32.mrb[2].mxu1 }
 0x156   : > { %797 = vst [vmem:[%s1573_s19 + $0x20] sm:$0xf] %v1022_v46  ;;  %v1024_v50 = vpack.c.bf16 %v1084_v49, %v1084_v49  ;;  %v572_v51 = vpop.f32.mrb[3].mxu1 }
 0x157   : > { %v466_v39 = vpop.f32.mrb[4].mxu0  ;;  %793 = vst [vmem:[%s1573_s19 + $0x8] sm:$0xf] %v1018_v48  ;;  %v1020_v52 = vpack.c.bf16 %v572_v51, %v572_v51 }
 0x158   : > { %v468_v40 = vpop.f32.mrb[5].mxu0  ;;  %799 = vst [vmem:[%s1573_s19 + $0x2c] sm:$0xf] %v1024_v50 }
 0x159   : > { %v1021_v41 = vpack.c.bf16 %v468_v40, %v466_v39  ;;  %v470_v42 = vpop.f32.mrb[6].mxu0  ;;  %795 = vst [vmem:[%s1573_s19 + $0x14] sm:$0xf] %v1020_v52 }
 0x15a   : > { %v472_v43 = vpop.f32.mrb[7].mxu0 }
 0x15b   : > { %796 = vst [vmem:[%s1573_s19 + $0x18] sm:$0xff] %v1021_v41  ;;  %v1023_v45 = vpack.c.bf16 %v472_v43, %v470_v42  ;;  %v1087_v58 = vpop.f32.mrb[4].mxu1 }
 0x15c   : > { %v1030_v60 = vpack.c.bf16 %v1087_v58, %v1087_v58  ;;  %v585_v61 = vpop.f32.mrb[5].mxu1 }
 0x15d   : > { %798 = vst [vmem:[%s1573_s19 + $0x24] sm:$0xff] %v1023_v45  ;;  %v1026_v62 = vpack.c.bf16 %v585_v61, %v585_v61  ;;  %v1088_v63 = vpop.f32.mrb[6].mxu1 }
 0x15e   : > { %805 = vst [vmem:[%s1573_s19 + $0x50] sm:$0xf] %v1030_v60  ;;  %v1032_v0 = vpack.c.bf16 %v1088_v63, %v1088_v63  ;;  %v588_v1 = vpop.f32.mrb[7].mxu1 }
 0x15f   : > { %v476_v53 = vpop.f32.mrb[8].mxu0  ;;  %801 = vst [vmem:[%s1573_s19 + $0x38] sm:$0xf] %v1026_v62  ;;  %v1028_v2 = vpack.c.bf16 %v588_v1, %v588_v1 }
 0x160   : > { %v478_v54 = vpop.f32.mrb[9].mxu0  ;;  %807 = vst [vmem:[%s1573_s19 + $0x5c] sm:$0xf] %v1032_v0 }
 0x161   : > { %v1025_v55 = vpack.c.bf16 %v478_v54, %v476_v53  ;;  %v480_v56 = vpop.f32.mrb[10].mxu0  ;;  %803 = vst [vmem:[%s1573_s19 + $0x44] sm:$0xf] %v1028_v2 }
 0x162   : > { %v482_v57 = vpop.f32.mrb[11].mxu0 }
 0x163   : > { %800 = vst [vmem:[%s1573_s19 + $0x30] sm:$0xff] %v1025_v55  ;;  %v1027_v59 = vpack.c.bf16 %v482_v57, %v480_v56  ;;  %v1091_v8 = vpop.f32.mrb[8].mxu1 }
 0x164   : > { %v1038_v10 = vpack.c.bf16 %v1091_v8, %v1091_v8  ;;  %v601_v11 = vpop.f32.mrb[9].mxu1 }
 0x165   : > { %802 = vst [vmem:[%s1573_s19 + $0x3c] sm:$0xff] %v1027_v59  ;;  %v1034_v12 = vpack.c.bf16 %v601_v11, %v601_v11  ;;  %v1092_v13 = vpop.f32.mrb[10].mxu1 }
 0x166   : > { %813 = vst [vmem:[%s1573_s19 + $0x80] sm:$0xf] %v1038_v10  ;;  %v1040_v14 = vpack.c.bf16 %v1092_v13, %v1092_v13  ;;  %v604_v15 = vpop.f32.mrb[11].mxu1 }
 0x167   : > { %v486_v3 = vpop.f32.mrb[12].mxu0  ;;  %809 = vst [vmem:[%s1573_s19 + $0x68] sm:$0xf] %v1034_v12  ;;  %v1036_v16 = vpack.c.bf16 %v604_v15, %v604_v15 }
 0x168   : > { %v488_v4 = vpop.f32.mrb[13].mxu0  ;;  %815 = vst [vmem:[%s1573_s19 + $0x8c] sm:$0xf] %v1040_v14 }
 0x169   : > { %v1029_v5 = vpack.c.bf16 %v488_v4, %v486_v3  ;;  %v490_v6 = vpop.f32.mrb[14].mxu0  ;;  %811 = vst [vmem:[%s1573_s19 + $0x74] sm:$0xf] %v1036_v16 }
 0x16a   : > { %v492_v7 = vpop.f32.mrb[15].mxu0 }
 0x16b   : > { %804 = vst [vmem:[%s1573_s19 + $0x48] sm:$0xff] %v1029_v5  ;;  %v1031_v9 = vpack.c.bf16 %v492_v7, %v490_v6  ;;  %v1095_v22 = vpop.f32.mrb[12].mxu1 }
 0x16c   : > { %v1046_v24 = vpack.c.bf16 %v1095_v22, %v1095_v22  ;;  %v617_v25 = vpop.f32.mrb[13].mxu1 }
 0x16d   : > { %806 = vst [vmem:[%s1573_s19 + $0x54] sm:$0xff] %v1031_v9  ;;  %v1042_v26 = vpack.c.bf16 %v617_v25, %v617_v25  ;;  %v1096_v27 = vpop.f32.mrb[14].mxu1 }
 0x16e   : > { %821 = vst [vmem:[%s1573_s19 + $0xb0] sm:$0xf] %v1046_v24  ;;  %v1048_v28 = vpack.c.bf16 %v1096_v27, %v1096_v27  ;;  %v620_v29 = vpop.f32.mrb[15].mxu1 }
 0x16f   : > { %v496_v17 = vpop.f32.mrb[16].mxu0  ;;  %817 = vst [vmem:[%s1573_s19 + $0x98] sm:$0xf] %v1042_v26  ;;  %v1044_v30 = vpack.c.bf16 %v620_v29, %v620_v29 }
 0x170   : > { %v498_v18 = vpop.f32.mrb[17].mxu0  ;;  %823 = vst [vmem:[%s1573_s19 + $0xbc] sm:$0xf] %v1048_v28 }
 0x171   : > { %v1033_v19 = vpack.c.bf16 %v498_v18, %v496_v17  ;;  %v500_v20 = vpop.f32.mrb[18].mxu0  ;;  %819 = vst [vmem:[%s1573_s19 + $0xa4] sm:$0xf] %v1044_v30 }
 0x172   : > { %v502_v21 = vpop.f32.mrb[19].mxu0 }
 0x173   : > { %808 = vst [vmem:[%s1573_s19 + $0x60] sm:$0xff] %v1033_v19  ;;  %v1035_v23 = vpack.c.bf16 %v502_v21, %v500_v20 }
 0x175   : > { %810 = vst [vmem:[%s1573_s19 + $0x6c] sm:$0xff] %v1035_v23 }
 0x177   : > { %v506_v31 = vpop.f32.mrb[20].mxu0 }
 0x178   : > { %v508_v32 = vpop.f32.mrb[21].mxu0 }
 0x179   : > { %v1037_v33 = vpack.c.bf16 %v508_v32, %v506_v31  ;;  %v510_v34 = vpop.f32.mrb[22].mxu0 }
 0x17a   : > { %v512_v35 = vpop.f32.mrb[23].mxu0 }
 0x17b   : > { %812 = vst [vmem:[%s1573_s19 + $0x78] sm:$0xff] %v1037_v33  ;;  %v1039_v36 = vpack.c.bf16 %v512_v35, %v510_v34 }
 0x17d   : > { %814 = vst [vmem:[%s1573_s19 + $0x84] sm:$0xff] %v1039_v36 }
 0x17f   : > { %v516_v37 = vpop.f32.mrb[24].mxu0 }
 0x180   : > { %v518_v38 = vpop.f32.mrb[25].mxu0 }
 0x181   : > { %v1041_v39 = vpack.c.bf16 %v518_v38, %v516_v37  ;;  %v520_v40 = vpop.f32.mrb[26].mxu0 }
 0x182   : > { %v522_v41 = vpop.f32.mrb[27].mxu0 }
 0x183   : > { %816 = vst [vmem:[%s1573_s19 + $0x90] sm:$0xff] %v1041_v39  ;;  %v1043_v42 = vpack.c.bf16 %v522_v41, %v520_v40 }
 0x185   : > { %818 = vst [vmem:[%s1573_s19 + $0x9c] sm:$0xff] %v1043_v42 }
 0x187   : > { %v526_v43 = vpop.f32.mrb[28].mxu0 }
 0x188   : > { %v528_v44 = vpop.f32.mrb[29].mxu0 }
 0x189   : > { %v1045_v45 = vpack.c.bf16 %v528_v44, %v526_v43  ;;  %v530_v46 = vpop.f32.mrb[30].mxu0 }
 0x18a   : > { %v532_v47 = vpop.f32.mrb[31].mxu0 }
 0x18b   : > { %820 = vst [vmem:[%s1573_s19 + $0xa8] sm:$0xff] %v1045_v45  ;;  %v1047_v48 = vpack.c.bf16 %v532_v47, %v530_v46 }
 0x18d   : > { %822 = vst [vmem:[%s1573_s19 + $0xb4] sm:$0xff] %v1047_v48 }
 0x18e   : > { %1290 = shalt.err (!%p1287_p5)
}
 0x18f   : > { %s1291_s3 = scalar_lea.hbm %s1610_s7, 3072  ;;  %s1295_s16 = scalar_lea.hbm %s1665_s2, 6144 }
 0x190   : > { %p1292_p9 = scmp.ne.s32.totalorder %s1610_s7, %s1291_s3  ;;  %p1296_p3 = scmp.lt.u32.totalorder %s1610_s7, %s1665_s2 }
 0x191   : > { %p1297_p7 = scmp.lt.u32.totalorder %s1295_s16, %s1291_s3  ;;  %p1299_p4 = scmp.lt.u32.totalorder %s1291_s3, %s1610_s7 }
 0x192   : > { %p1293_p1 = pnand %p1292_p9, %p1486_p10 }
 0x193   : > { %p1298_p13 = por %p1297_p7, %p1296_p3 }
 0x194   : > { %p1294_p2 = pneg %p1293_p1 }
 0x195   : > { %p1300_p6 = por %p1299_p4, %p1298_p13 }
 0x197   : > { %p1301_p8 = pnand %p1300_p6, %p1294_p2 }
 0x199   : > { %1304 = shalt.err (!%p1301_p8)
}
 0x19a   : > { %s1373_s17 = smov 192   ;;  %s1374_s19 = smov 12  }
 0x19b   : > { %1105 = dma.vmem_to_hbm [thread:$0]  (%p1486_p10), %s1612_s4, 3072, %s1610_s7, %s825_s12, %s1373_s17, %s1373_s17, %s1374_s19  }
 0x19c PF: > { %s856_s21 = sand.u32 1, %s1343_s9   ;;  %p1683_p12 = scmp.ne.s32.totalorder %s1673_s20, 0 }
 0x19d   : > { %p1684_p11 = scmp.ge.s32.totalorder %s1363_s14, 2  ;;  %s857_s5 = scalar_lea.sflag [#allocation4], %s856_s21 }
 0x19f   : > { %p1116_p0 = pnand %p1684_p11, %p1683_p12 }
 0x1a1   : > { %1338 = dma.done.wait (!%p1116_p0), %s857_s5, 3072  }
 0x1a2   : > { %1340 = vsyncadd (!%p1116_p0), %s857_s5, 4294964224  ;;  %s19_s14 = sadd.s32 1, %s1363_s14   ;;  %s1685_s9 = smov %s1347_s10 }
 0x1a3   : > { %p16_p5 = scmp.ge.s32.totalorder %s19_s14, 4   ;;  %s1686_s10 = smov %s1351_s11 }
 0x1a4   : > { %s1687_s11 = smov %s1495_s28  ;;  %s1688_s12 = smov %s1359_s13 }
 0x1a5   : > { %s1689_s13 = smov %s1691_s25  ;;  %18 = sbr.rel (!%p16_p5) target bundleno = 7 (0x7), region = 77 }
 0x1ac   :  { %862 = vsyncpa [#allocation3], 1 }
 0x1ad   :  { %864 = vsyncpa [#allocation3 + $0x1], 1 }
 0x1ae   :  { %865 = vsyncpa [#allocation6], 1 }
 0x1af   :  { %866 = vsyncpa [#allocation4], 1 }
 0x1b0   :  { %868 = vsyncpa [#allocation4 + $0x1], 1 }

</bundles_post_ra>
